<compile_context>
chip_gen: v6e
topology: v6e:2x2x1
jax: 0.10.0
libtpu: 0.0.40
codegen_flags: <defaults>
</compile_context>

<pallas_src>
import functools

import jax
import jax.numpy as jnp
from jax.experimental import pallas as pl
from jax.experimental.pallas import tpu as pltpu

F32 = jnp.float32
BF16 = jnp.bfloat16


# --------------------------------------------------------------------------- #
# Kernels
# --------------------------------------------------------------------------- #
def _xw_kernel(x_ref, w_ref, out_ref):
    """Row-tiled dense feature transform: out = x @ W1 (bf16 out, f32 accum)."""
    out_ref[...] = jnp.dot(
        x_ref[...], w_ref[...], preferred_element_type=jnp.float32
    ).astype(out_ref.dtype)


def _prop1_kernel(a_ref, xw_ref, b1_ref, wp_ref, bp_ref, w2_ref,
                  z_ref, proj_ref, hw2_ref, acc_ref, *, xw_resident):
    """acc = A @ xW1; epilogue: z = acc+b1, proj = z@Wp+bp, hw2 = relu(z)@W2."""
    k = pl.program_id(1)

    @pl.when(k == 0)
    def _():
        acc_ref[...] = jnp.zeros_like(acc_ref)

    tk = a_ref.shape[1]
    if xw_resident:
        # xw_ref holds the full (Np, Hp) matrix in VMEM (fetched once); slice
        # the k-th aligned row block.
        off = pl.multiple_of(k * tk, tk)
        xw = xw_ref[pl.ds(off, tk), :]
    else:
        xw = xw_ref[...]

    acc_ref[...] += jnp.dot(a_ref[...], xw, preferred_element_type=jnp.float32)

    @pl.when(k == pl.num_programs(1) - 1)
    def _():
        z = acc_ref[...] + b1_ref[...]
        z_ref[...] = z
        zb = z.astype(wp_ref.dtype)
        proj_ref[...] = jnp.dot(
            zb, wp_ref[...], preferred_element_type=jnp.float32) + bp_ref[...]
        h = jnp.maximum(z, 0.0).astype(w2_ref.dtype)
        hw2_ref[...] = jnp.dot(
            h, w2_ref[...], preferred_element_type=jnp.float32
        ).astype(hw2_ref.dtype)


def _prop2_kernel(a_ref, hw_ref, b2_ref, recon_ref, acc_ref, *, hw_resident):
    """acc = A @ (relu(z)W2); epilogue: recon = acc + b2."""
    k = pl.program_id(1)

    @pl.when(k == 0)
    def _():
        acc_ref[...] = jnp.zeros_like(acc_ref)

    tk = a_ref.shape[1]
    if hw_resident:
        off = pl.multiple_of(k * tk, tk)
        hw = hw_ref[pl.ds(off, tk), :]
    else:
        hw = hw_ref[...]

    acc_ref[...] += jnp.dot(a_ref[...], hw, preferred_element_type=jnp.float32)

    @pl.when(k == pl.num_programs(1) - 1)
    def _():
        recon_ref[...] = acc_ref[...] + b2_ref[...]


# --------------------------------------------------------------------------- #
# Tiling / VMEM heuristics
# --------------------------------------------------------------------------- #
def _pad_to(n: int, m: int) -> int:
    return ((n + m - 1) // m) * m


def _pad2d(a, rows, cols):
    r, c = a.shape
    return jnp.pad(a, ((0, rows - r), (0, cols - c)))


def _vmem_limit_bytes() -> int:
    """~3/4 of physical VMEM: ~96 MiB on v5e/v6e (128 MiB), ~48 MiB on v7x (64 MiB)."""
    try:
        phys = int(pltpu.get_tpu_info().vmem_capacity_bytes)
    except Exception:  # query unavailable -> assume the smallest (v7x) budget
        phys = 64 * 1024 * 1024
    return int(min(phys * 3 // 4, 100 * 1024 * 1024))


def _select_tiles(np_: int, hp: int, cp: int, vmem_limit: int):
    """Pick (tm, tk) and decide whether xw1 / hw2 can live fully in VMEM."""
    bf, f4 = 2, 4
    big = vmem_limit >= 80 * 1024 * 1024
    cands = [t for t in ((1024, 512, 256) if big else (512, 256)) if np_ % t == 0]
    tm = cands[0] if cands else 256
    tk = cands[0] if cands else 256

    xw_res = 2 * np_ * hp * bf <= vmem_limit // 3
    hw_res = 2 * np_ * cp * bf <= vmem_limit // 3

    def stage2_bytes(tm_, tk_, res_):
        a = 2 * tm_ * tk_ * bf                                    # A tile (dbl buf)
        xw = 2 * (np_ * hp * bf if res_ else tk_ * hp * bf)       # xw1
        consts = 2 * (hp * f4 + hp * hp * bf + hp * f4 + hp * cp * bf)  # b1,Wp,bp,W2
        outs = 2 * (tm_ * hp * f4 + tm_ * hp * f4 + tm_ * cp * bf)      # z,proj,hw2
        return a + xw + consts + outs + tm_ * hp * f4             # + f32 acc

    def stage3_bytes(tm_, tk_, res_):
        a = 2 * tm_ * tk_ * bf
        hw = 2 * (np_ * cp * bf if res_ else tk_ * cp * bf)
        return a + hw + 2 * cp * f4 + 2 * tm_ * cp * f4 + tm_ * cp * f4

    def fits(tm_, tk_, xr, hr):
        return (stage2_bytes(tm_, tk_, xr) <= vmem_limit
                and stage3_bytes(tm_, tk_, hr) <= vmem_limit)

    while not fits(tm, tk, xw_res, hw_res) and tm > 256:
        tm //= 2
    while not fits(tm, tk, xw_res, hw_res) and tk > 256:
        tk //= 2
    if not fits(tm, tk, xw_res, hw_res):
        xw_res = hw_res = False
    return tm, tk, xw_res, hw_res


# --------------------------------------------------------------------------- #
# Wrapper
# --------------------------------------------------------------------------- #
def gcn_encoder_forward(x, a_hat, params):
    """Forward pass of GCNEncoder. Returns (recon, z, proj)."""
    n, c_in = x.shape
    hidden = params["w1"].shape[1]

    # 256-padded shapes: lane-dense outputs + fully-filled 256-wide MXU (v6e/v7x).
    cp = _pad_to(c_in, 256)
    hp = _pad_to(hidden, 256)
    np_ = _pad_to(n, 256)

    vmem_limit = _vmem_limit_bytes()
    tm, tk, xw_res, hw_res = _select_tiles(np_, hp, cp, vmem_limit)

    # bf16 cast BEFORE padding (halves the one-off padded-copy HBM traffic of A).
    a_p = _pad2d(a_hat.astype(BF16), np_, np_)
    x_p = _pad2d(x.astype(BF16), np_, cp)
    w1_p = _pad2d(params["w1"].astype(BF16), cp, hp)
    b1_p = _pad2d(params["b1"].reshape(1, -1).astype(F32), 1, hp)
    w2_p = _pad2d(params["w2"].astype(BF16), hp, cp)
    b2_p = _pad2d(params["b2"].reshape(1, -1).astype(F32), 1, cp)
    wp_p = _pad2d(params["wp"].astype(BF16), hp, hp)
    bp_p = _pad2d(params["bp"].reshape(1, -1).astype(F32), 1, hp)

    cparams_1d = pltpu.CompilerParams(
        dimension_semantics=("parallel",), vmem_limit_bytes=vmem_limit)
    cparams_2d = pltpu.CompilerParams(
        dimension_semantics=("parallel", "arbitrary"),
        vmem_limit_bytes=vmem_limit)

    # ---- stage 1: xw1 = x @ W1 (row-tiled, lane-dense, bf16 out) ------------
    xw1 = pl.pallas_call(
        _xw_kernel,
        out_shape=jax.ShapeDtypeStruct((np_, hp), BF16),
        grid=(np_ // tm,),
        in_specs=[pl.BlockSpec((tm, cp), lambda i: (i, 0)),
                  pl.BlockSpec((cp, hp), lambda i: (0, 0))],   # W1 resident
        out_specs=pl.BlockSpec((tm, hp), lambda i: (i, 0)),
        compiler_params=cparams_1d,
        cost_estimate=pl.CostEstimate(
            flops=2 * np_ * cp * hp, transcendentals=0,
            bytes_accessed=2 * (np_ * cp + cp * hp + np_ * hp)),
    )(x_p, w1_p)

    grid2 = (np_ // tm, np_ // tk)
    n_row_tiles = np_ // tm

    # xw1 / hw2 specs: VMEM-resident full array when it fits, else streamed per k.
    if xw_res:
        xw_spec = pl.BlockSpec((np_, hp), lambda i, k: (0, 0))
        xw_bytes = 2 * np_ * hp
    else:
        xw_spec = pl.BlockSpec((tk, hp), lambda i, k: (k, 0))
        xw_bytes = 2 * np_ * hp * n_row_tiles          # re-read once per row tile
    if hw_res:
        hw_spec = pl.BlockSpec((np_, cp), lambda i, k: (0, 0))
        hw_bytes = 2 * np_ * cp
    else:
        hw_spec = pl.BlockSpec((tk, cp), lambda i, k: (k, 0))
        hw_bytes = 2 * np_ * cp * n_row_tiles

    # ---- stage 2: z = A@xW1 + b1; proj = z@Wp + bp; hw2 = relu(z)@W2 --------
    z_p, proj_p, hw2_p = pl.pallas_call(
        functools.partial(_prop1_kernel, xw_resident=xw_res),
        out_shape=(
            jax.ShapeDtypeStruct((np_, hp), F32),    # z
            jax.ShapeDtypeStruct((np_, hp), F32),    # proj
            jax.ShapeDtypeStruct((np_, cp), BF16),   # relu(z) @ W2
        ),
        grid=grid2,
        in_specs=[
            pl.BlockSpec((tm, tk), lambda i, k: (i, k)),     # A tile (streamed)
            xw_spec,                                         # xw1 (resident/streamed)
            pl.BlockSpec((1, hp), lambda i, k: (0, 0)),      # b1 (resident)
            pl.BlockSpec((hp, hp), lambda i, k: (0, 0)),     # Wp (resident)
            pl.BlockSpec((1, hp), lambda i, k: (0, 0)),      # bp (resident)
            pl.BlockSpec((hp, cp), lambda i, k: (0, 0)),     # W2 (resident)
        ],
        out_specs=(
            pl.BlockSpec((tm, hp), lambda i, k: (i, 0)),
            pl.BlockSpec((tm, hp), lambda i, k: (i, 0)),
            pl.BlockSpec((tm, cp), lambda i, k: (i, 0)),
        ),
        scratch_shapes=[pltpu.VMEM((tm, hp), F32)],
        compiler_params=cparams_2d,
        cost_estimate=pl.CostEstimate(
            flops=2 * np_ * np_ * hp + 2 * np_ * hp * hp + 2 * np_ * hp * cp,
            transcendentals=0,
            bytes_accessed=(2 * np_ * np_            # A stream (bf16)
                            + xw_bytes               # xw1 (resident or re-read)
                            + 2 * (hp * hp + hp * cp) + 4 * 2 * hp   # weights/biases
                            + 4 * np_ * hp + 4 * np_ * hp            # z, proj (f32)
                            + 2 * np_ * cp)),                        # hw2 (bf16)
    )(a_p, xw1, b1_p, wp_p, bp_p, w2_p)

    # ---- stage 3: recon = A @ hw2 + b2 --------------------------------------
    recon_p = pl.pallas_call(
        functools.partial(_prop2_kernel, hw_resident=hw_res),
        out_shape=jax.ShapeDtypeStruct((np_, cp), F32),
        grid=grid2,
        in_specs=[
            pl.BlockSpec((tm, tk), lambda i, k: (i, k)),     # A tile
            hw_spec,                                         # hw2 (resident/streamed)
            pl.BlockSpec((1, cp), lambda i, k: (0, 0)),      # b2 (resident)
        ],
        out_specs=pl.BlockSpec((tm, cp), lambda i, k: (i, 0)),
        scratch_shapes=[pltpu.VMEM((tm, cp), F32)],
        compiler_params=cparams_2d,
        cost_estimate=pl.CostEstimate(
            flops=2 * np_ * np_ * cp, transcendentals=0,
            bytes_accessed=2 * np_ * np_ + hw_bytes + 4 * cp + 4 * np_ * cp),
    )(a_p, hw2_p, b2_p)

    return recon_p[:n, :c_in], z_p[:n, :hidden], proj_p[:n, :hidden]


# --------------------------------------------------------------------------- #
# Graph / parameter construction
# --------------------------------------------------------------------------- #
def build_normalized_adjacency(edge_index, num_nodes):
    """Dense GCN normalization A_hat = D^-1/2 (A + I) D^-1/2 (self-loops added)."""
    src, dst = edge_index[0], edge_index[1]
    a = jnp.zeros((num_nodes, num_nodes), jnp.float32)
    a = a.at[dst, src].add(1.0)          # message flows src -> dst (PyG convention)
    a = a + jnp.eye(num_nodes, dtype=jnp.float32)
    deg = a.sum(axis=1)
    d_inv_sqrt = jnp.where(deg > 0, 1.0 / jnp.sqrt(deg), 0.0)
    return d_inv_sqrt[:, None] * a * d_inv_sqrt[None, :]


def init_params(key, in_channels, hidden_channels):
    k1, k2, k3, k4, k5, k6 = jax.random.split(key, 6)

    def glorot(k, fan_in, fan_out):
        limit = jnp.sqrt(6.0 / (fan_in + fan_out))
        return jax.random.uniform(k, (fan_in, fan_out), jnp.float32, -limit, limit)

    return {
        "w1": glorot(k1, in_channels, hidden_channels),
        "b1": 0.1 * jax.random.normal(k4, (1, hidden_channels), jnp.float32),
        "w2": glorot(k2, hidden_channels, in_channels),
        "b2": 0.1 * jax.random.normal(k5, (1, in_channels), jnp.float32),
        "wp": glorot(k3, hidden_channels, hidden_channels),
        "bp": 0.1 * jax.random.normal(k6, (1, hidden_channels), jnp.float32),
    }


# --------------------------------------------------------------------------- #
# Demo / self-check
# --------------------------------------------------------------------------- #
if __name__ == "__main__":
    N = 16
    IN_CHANNELS = 8
    HIDDEN = 32

    key = jax.random.PRNGKey(0)
    kx, kp = jax.random.split(key)

    x = jax.random.normal(kx, (N, IN_CHANNELS), jnp.float32)

    # deterministic ring graph (undirected: both directions)
    src = jnp.arange(N, dtype=jnp.int32)
    dst = (src + 1) % N
    edge_index = jnp.stack(
        [jnp.concatenate([src, dst]), jnp.concatenate([dst, src])], axis=0)

    a_hat = build_normalized_adjacency(edge_index, N)
    params = init_params(kp, IN_CHANNELS, HIDDEN)

    recon, z, proj = gcn_encoder_forward(x, a_hat, params)
    jax.block_until_ready((recon, z, proj))

    assert recon.shape == (N, IN_CHANNELS)
    assert z.shape == (N, HIDDEN)
    assert proj.shape == (N, HIDDEN)

    # --- mixed-precision reference (same bf16 casts the kernel uses) ---------
    a_b = a_hat.astype(BF16)
    x_b = x.astype(BF16)
    w1_b = params["w1"].astype(BF16)
    w2_b = params["w2"].astype(BF16)
    wp_b = params["wp"].astype(BF16)

    xw1_r = jnp.dot(x_b, w1_b, preferred_element_type=F32).astype(BF16)
    z_r = jnp.dot(a_b, xw1_r, preferred_element_type=F32) + params["b1"]
    proj_r = jnp.dot(z_r.astype(BF16), wp_b,
                     preferred_element_type=F32) + params["bp"]
    hw2_r = jnp.dot(jnp.maximum(z_r, 0.0).astype(BF16), w2_b,
                    preferred_element_type=F32).astype(BF16)
    recon_r = jnp.dot(a_b, hw2_r, preferred_element_type=F32) + params["b2"]

    assert jnp.allclose(z, z_r, atol=3e-2, rtol=3e-2)
    assert jnp.allclose(proj, proj_r, atol=3e-2, rtol=3e-2)
    assert jnp.allclose(recon, recon_r, atol=3e-2, rtol=3e-2)

    # --- loose sanity check against the full-f32 reference -------------------
    z_f = a_hat @ (x @ params["w1"]) + params["b1"]
    recon_f = a_hat @ (jnp.maximum(z_f, 0.0) @ params["w2"]) + params["b2"]
    proj_f = z_f @ params["wp"] + params["bp"]
    assert jnp.allclose(z, z_f, atol=1.5e-1, rtol=1.5e-1)
    assert jnp.allclose(recon, recon_f, atol=1.5e-1, rtol=1.5e-1)
    assert jnp.allclose(proj, proj_f, atol=1.5e-1, rtol=1.5e-1)

    print("KERNEL_OK")
</pallas_src>

<mosaic_0001>
module attributes {stable_mosaic.version = 11 : i64} {
  func.func @_xw_kernel(%arg0: i32, %arg1: memref<256x256xbf16, #tpu.memory_space<vmem>>, %arg2: memref<256x256xbf16, #tpu.memory_space<vmem>>, %arg3: memref<256x256xbf16, #tpu.memory_space<vmem>>) attributes {dimension_semantics = [#tpu.dimension_semantics<parallel>], iteration_bounds = array<i64: 1>, scalar_prefetch = 0 : i64, scratch_operands = 0 : i64, tpu.core_type = #tpu.core_type<tc>, window_params = [{transform_indices = @transform_0, window_bounds = array<i64: 256, 256>}, {pipeline_mode = #tpu.pipeline_mode<synchronous>, transform_indices = @transform_1, window_bounds = array<i64: 256, 256>}, {transform_indices = @transform_2, window_bounds = array<i64: 256, 256>}]} {
    %c0 = arith.constant 0 : index
    %c0_0 = arith.constant 0 : index
    %0 = vector.load %arg1[%c0, %c0_0] : memref<256x256xbf16, #tpu.memory_space<vmem>>, vector<256x256xbf16>
    %c0_1 = arith.constant 0 : index
    %c0_2 = arith.constant 0 : index
    %1 = vector.load %arg2[%c0_1, %c0_2] : memref<256x256xbf16, #tpu.memory_space<vmem>>, vector<256x256xbf16>
    %cst = arith.constant dense<0.000000e+00> : vector<256x256xf32>
    %2 = tpu.matmul %0, %1, %cst {dimension_numbers = #tpu.dot_dimension_numbers<[1], [0], [0], [1], [0, 0, 1, 1], [], []>} : vector<256x256xbf16>, vector<256x256xbf16>, vector<256x256xf32> -> vector<256x256xf32>
    %3 = arith.truncf %2 : vector<256x256xf32> to vector<256x256xbf16>
    %c0_3 = arith.constant 0 : index
    %c0_4 = arith.constant 0 : index
    %4 = vector.load %arg3[%c0_3, %c0_4] : memref<256x256xbf16, #tpu.memory_space<vmem>>, vector<256x256xbf16>
    tpu.vector_store %arg3[%c0_3, %c0_4], %3 {strides = array<i32>} : memref<256x256xbf16, #tpu.memory_space<vmem>>, vector<256x256xbf16>,
    return
  }
  func.func @transform_0(%arg0: i32) -> (i32, i32) {
    %c0_i32 = arith.constant 0 : i32
    %c0_i32_0 = arith.constant 0 : i32
    return %arg0, %c0_i32 : i32, i32
  }
  func.func @transform_1(%arg0: i32) -> (i32, i32) {
    %c0_i32 = arith.constant 0 : i32
    %c0_i32_0 = arith.constant 0 : i32
    %c0_i32_1 = arith.constant 0 : i32
    return %c0_i32, %c0_i32_0 : i32, i32
  }
  func.func @transform_2(%arg0: i32) -> (i32, i32) {
    %c0_i32 = arith.constant 0 : i32
    %c0_i32_0 = arith.constant 0 : i32
    return %arg0, %c0_i32 : i32, i32
  }
}

</mosaic_0001>

<bundles_post_ra>
// kernel: tpu_custom_call.1
= control target key start
LH: loop header
LB: loop body
LE: loop exit
PB: predicated region body
PF: predicated region fallthrough
CT: control target
= control target key end

     0   :  { %7 = vsyncpa [#allocation3], 0  ;;  %s1224_s0 = inlined_call_operand.hbm [shape: bf16[256,256], index: 0, kind: input, shape index: {}]   ;;  %s1225_s1 = inlined_call_operand.hbm [shape: bf16[256,256], index: 1, kind: input, shape index: {}]   ;;  %s1226_s2 = inlined_call_operand.hbm [shape: bf16[256,256], index: 2, kind: output, shape index: {}]  }
   0x1   :  { %8 = vsyncpa [#allocation6], 0 }
   0x2   :  { %9 = vsyncpa [#allocation4], 0  ;;  %s1186_s9 = smov [#allocation2]  }
   0x3   :  { %s15_s10 = sshll.u32 %s1186_s9, 4  ;;  %s16_s10 = int_to_ptr.vmem [resolvable:$true] %s15_s10 }
   0x4   :  { %s1128_s11 = scalar_lea.vmem %s16_s10, 4096  ;;  %p1133_p1 = scmp.lt.s32.totalorder %s16_s10, %s16_s10 }
   0x5   :  { %p1129_p0 = scmp.ne.s32.totalorder %s16_s10, %s1128_s11  ;;  %p1134_p2 = scmp.lt.s32.totalorder %s1128_s11, %s1128_s11 }
   0x7   :  { %p1135_p3 = por %p1134_p2, %p1133_p1 }
   0x9   :  { %p1136_p4 = pnand %p1135_p3, %p1129_p0 }
   0xb   :  { %1139 = shalt.err (!%p1136_p4)
}
   0xc   :  { %s1187_s12 = smov 128   ;;  %s1188_s13 = smov 8  }
   0xd   :  { %21 = dma.hbm_to_vmem [thread:$0]  %s1224_s0, 4096, %s16_s10, [#allocation3], %s1187_s12, %s1187_s12, %s1188_s13  }
   0xe   :  { %s1189_s16 = smov [#allocation5]  }
   0xf   :  { %s27_s17 = sshll.u32 %s1189_s16, 4  ;;  %s28_s17 = int_to_ptr.vmem [resolvable:$true] %s27_s17 }
  0x10   :  { %s1148_s18 = scalar_lea.vmem %s28_s17, 4096  ;;  %p1153_p6 = scmp.lt.s32.totalorder %s28_s17, %s28_s17 }
  0x11   :  { %p1149_p5 = scmp.ne.s32.totalorder %s28_s17, %s1148_s18  ;;  %p1154_p7 = scmp.lt.s32.totalorder %s1148_s18, %s1148_s18 }
  0x13   :  { %p1155_p8 = por %p1154_p7, %p1153_p6 }
  0x15   :  { %p1156_p9 = pnand %p1155_p8, %p1149_p5 }
  0x17   :  { %1159 = shalt.err (!%p1156_p9)
}
  0x18   :  { %33 = dma.hbm_to_vmem [thread:$0]  %s1225_s1, 4096, %s28_s17, [#allocation6], %s1187_s12, %s1187_s12, %s1188_s13  }
  0x19   :  { %1180 = dma.done.wait [#allocation3], 4096  }
  0x1a   :  { %1181 = vsyncadd [#allocation3], 4294963200 }
  0x1b   :  { %1182 = dma.done.wait [#allocation6], 4096  }
  0x1c   :  { %1183 = vsyncadd [#allocation6], 4294963200  ;;  %v1024_v0 = vld [vmem:[#allocation5 + $0x74] ss:$8 sps:$4 sm:$0xff]   ;;  %v1026_v1 = vld [vmem:[#allocation5 + $0x70] ss:$8 sps:$4 sm:$0xff]  }
  0x1d   :  { %424 = vmatprep.subr.bf16.mxu0 %v1024_v0  ;;  %987 = vmatprep.subr.bf16.mxu1 %v1024_v0  ;;  %v1027_v2 = vld [vmem:[#allocation5 + $0x64] ss:$8 sps:$4 sm:$0xff]   ;;  %v1029_v3 = vld [vmem:[#allocation5 + $0x60] ss:$8 sps:$4 sm:$0xff]   ;;  %v1030_v4 = vld [vmem:[#allocation5 + $0x54] ss:$8 sps:$4 sm:$0xff]  }
  0x1e   :  { %425 = vmatpush1.bf16.msra.mxu0 %v1026_v1  ;;  %1003 = vmatpush1.bf16.msra.mxu1 %v1026_v1  ;;  %v1032_v5 = vld [vmem:[#allocation5 + $0x50] ss:$8 sps:$4 sm:$0xff]   ;;  %v1033_v6 = vld [vmem:[#allocation5 + $0x44] ss:$8 sps:$4 sm:$0xff]   ;;  %v1035_v7 = vld [vmem:[#allocation5 + $0x40] ss:$8 sps:$4 sm:$0xff]  }
  0x1f   :  { %426 = vmatprep.subr.bf16.mxu0 %v1027_v2  ;;  %988 = vmatprep.subr.bf16.mxu1 %v1027_v2  ;;  %v1036_v8 = vld [vmem:[#allocation5 + $0x34] ss:$8 sps:$4 sm:$0xff]   ;;  %v1038_v9 = vld [vmem:[#allocation5 + $0x30] ss:$8 sps:$4 sm:$0xff]   ;;  %v1039_v10 = vld [vmem:[#allocation5 + $0x24] ss:$8 sps:$4 sm:$0xff]  }
  0x20   :  { %v1041_v11 = vld [vmem:[#allocation5 + $0x20] ss:$8 sps:$4 sm:$0xff]   ;;  %v1042_v12 = vld [vmem:[#allocation5 + $0x14] ss:$8 sps:$4 sm:$0xff]   ;;  %v1074_v13 = vld [vmem:[#allocation2 + $0x4] ss:$8 sps:$4 sm:$0xff]  }
  0x21   :  { %v1044_v14 = vld [vmem:[#allocation5 + $0x10] ss:$8 sps:$4 sm:$0xff]   ;;  %v1077_v15 = vld [vmem:[#allocation2 + $0x84] ss:$8 sps:$4 sm:$0xff]   ;;  %456 = vmatprep.mubr.bf16.mxu0 %v1074_v13  ;;  %v1047_v17 = vld [vmem:[#allocation5] ss:$8 sps:$4 sm:$0xff]  }
  0x22   :  { %427 = vmatpush1.bf16.msra.mxu0 %v1029_v3  ;;  %1004 = vmatpush1.bf16.msra.mxu1 %v1029_v3  ;;  %v1045_v16 = vld [vmem:[#allocation5 + $0x4] ss:$8 sps:$4 sm:$0xff]   ;;  %v1048_v18 = vld [vmem:[#allocation5 + $0xf4] ss:$8 sps:$4 sm:$0xff]   ;;  %v1050_v19 = vld [vmem:[#allocation5 + $0xf0] ss:$8 sps:$4 sm:$0xff]  }
  0x23   :  { %428 = vmatprep.subr.bf16.mxu0 %v1030_v4  ;;  %989 = vmatprep.subr.bf16.mxu1 %v1030_v4  ;;  %v1051_v20 = vld [vmem:[#allocation5 + $0xe4] ss:$8 sps:$4 sm:$0xff]   ;;  %v1053_v21 = vld [vmem:[#allocation5 + $0xe0] ss:$8 sps:$4 sm:$0xff]   ;;  %v1054_v22 = vld [vmem:[#allocation5 + $0xd4] ss:$8 sps:$4 sm:$0xff]  }
  0x24   :  { %536 = vmatprep.mubr.bf16.mxu1 %v1077_v15  ;;  %v1056_v23 = vld [vmem:[#allocation5 + $0xd0] ss:$8 sps:$4 sm:$0xff]   ;;  %v1057_v24 = vld [vmem:[#allocation5 + $0xc4] ss:$8 sps:$4 sm:$0xff]   ;;  %v1059_v25 = vld [vmem:[#allocation5 + $0xc0] ss:$8 sps:$4 sm:$0xff]  }
  0x25   :  { %v1060_v26 = vld [vmem:[#allocation5 + $0xb4] ss:$8 sps:$4 sm:$0xff]   ;;  %v1062_v27 = vld [vmem:[#allocation5 + $0xb0] ss:$8 sps:$4 sm:$0xff]   ;;  %v1063_v28 = vld [vmem:[#allocation5 + $0xa4] ss:$8 sps:$4 sm:$0xff]  }
  0x26   :  { %429 = vmatpush1.bf16.msra.mxu0 %v1032_v5  ;;  %1005 = vmatpush1.bf16.msra.mxu1 %v1032_v5  ;;  %v1065_v29 = vld [vmem:[#allocation5 + $0xa0] ss:$8 sps:$4 sm:$0xff]   ;;  %v1066_v30 = vld [vmem:[#allocation5 + $0x94] ss:$8 sps:$4 sm:$0xff]   ;;  %v1068_v31 = vld [vmem:[#allocation5 + $0x90] ss:$8 sps:$4 sm:$0xff]  }
  0x27   :  { %430 = vmatprep.subr.bf16.mxu0 %v1033_v6  ;;  %990 = vmatprep.subr.bf16.mxu1 %v1033_v6  ;;  %v1069_v32 = vld [vmem:[#allocation5 + $0x84] ss:$8 sps:$4 sm:$0xff]   ;;  %v1071_v33 = vld [vmem:[#allocation5 + $0x80] ss:$8 sps:$4 sm:$0xff]   ;;  %v1078_v36 = vld [vmem:[#allocation2 + $0x14] ss:$8 sps:$4 sm:$0xff]  }
  0x28   :  { %v1072_v34 = vld [vmem:[#allocation2] ss:$8 sps:$4 sm:$0xff]   ;;  %v1080_v37 = vld [vmem:[#allocation2 + $0x94] ss:$8 sps:$4 sm:$0xff]   ;;  %v1082_v38 = vld [vmem:[#allocation2 + $0x10] ss:$8 sps:$4 sm:$0xff]  }
  0x29   :  { %v1075_v35 = vld [vmem:[#allocation2 + $0x80] ss:$8 sps:$4 sm:$0xff]   ;;  %v1083_v39 = vld [vmem:[#allocation2 + $0x90] ss:$8 sps:$4 sm:$0xff]   ;;  %v1084_v40 = vld [vmem:[#allocation2 + $0x24] ss:$8 sps:$4 sm:$0xff]  }
  0x2a   :  { %431 = vmatpush1.bf16.msra.mxu0 %v1035_v7  ;;  %1006 = vmatpush1.bf16.msra.mxu1 %v1035_v7  ;;  %v1086_v41 = vld [vmem:[#allocation2 + $0xa4] ss:$8 sps:$4 sm:$0xff]   ;;  %v1088_v42 = vld [vmem:[#allocation2 + $0x20] ss:$8 sps:$4 sm:$0xff]   ;;  %v1090_v44 = vld [vmem:[#allocation2 + $0x34] ss:$8 sps:$4 sm:$0xff]  }
  0x2b   :  { %432 = vmatprep.subr.bf16.mxu0 %v1036_v8  ;;  %991 = vmatprep.subr.bf16.mxu1 %v1036_v8  ;;  %v1089_v43 = vld [vmem:[#allocation2 + $0xa0] ss:$8 sps:$4 sm:$0xff]   ;;  %v1092_v45 = vld [vmem:[#allocation2 + $0xb4] ss:$8 sps:$4 sm:$0xff]   ;;  %v1094_v46 = vld [vmem:[#allocation2 + $0x30] ss:$8 sps:$4 sm:$0xff]  }
  0x2c   :  { %v1095_v47 = vld [vmem:[#allocation2 + $0xb0] ss:$8 sps:$4 sm:$0xff]   ;;  %v1096_v48 = vld [vmem:[#allocation2 + $0x44] ss:$8 sps:$4 sm:$0xff]   ;;  %v1100_v50 = vld [vmem:[#allocation2 + $0x40] ss:$8 sps:$4 sm:$0xff]  }
  0x2d   :  { %v1098_v49 = vld [vmem:[#allocation2 + $0xc4] ss:$8 sps:$4 sm:$0xff]   ;;  %v1101_v51 = vld [vmem:[#allocation2 + $0xc0] ss:$8 sps:$4 sm:$0xff]   ;;  %v1102_v52 = vld [vmem:[#allocation2 + $0x54] ss:$8 sps:$4 sm:$0xff]  }
  0x2e   :  { %433 = vmatpush1.bf16.msra.mxu0 %v1038_v9  ;;  %1007 = vmatpush1.bf16.msra.mxu1 %v1038_v9  ;;  %v1104_v53 = vld [vmem:[#allocation2 + $0xd4] ss:$8 sps:$4 sm:$0xff]   ;;  %v1106_v54 = vld [vmem:[#allocation2 + $0x50] ss:$8 sps:$4 sm:$0xff]   ;;  %v1108_v56 = vld [vmem:[#allocation2 + $0x64] ss:$8 sps:$4 sm:$0xff]  }
  0x2f   :  { %434 = vmatprep.subr.bf16.mxu0 %v1039_v10  ;;  %992 = vmatprep.subr.bf16.mxu1 %v1039_v10  ;;  %v1107_v55 = vld [vmem:[#allocation2 + $0xd0] ss:$8 sps:$4 sm:$0xff]   ;;  %v1110_v57 = vld [vmem:[#allocation2 + $0xe4] ss:$8 sps:$4 sm:$0xff]   ;;  %v1112_v58 = vld [vmem:[#allocation2 + $0x60] ss:$8 sps:$4 sm:$0xff]  }
  0x30   :  { %v1113_v59 = vld [vmem:[#allocation2 + $0xe0] ss:$8 sps:$4 sm:$0xff]   ;;  %v1114_v60 = vld [vmem:[#allocation2 + $0x74] ss:$8 sps:$4 sm:$0xff]   ;;  %v1118_v62 = vld [vmem:[#allocation2 + $0x70] ss:$8 sps:$4 sm:$0xff]  }
  0x31   :  { %v1116_v61 = vld [vmem:[#allocation2 + $0xf4] ss:$8 sps:$4 sm:$0xff]   ;;  %v1119_v63 = vld [vmem:[#allocation2 + $0xf0] ss:$8 sps:$4 sm:$0xff]   ;;  %s1190_s0 = smov [#allocation7]  }
  0x32   :  { %435 = vmatpush1.bf16.msra.mxu0 %v1041_v11  ;;  %1008 = vmatpush1.bf16.msra.mxu1 %v1041_v11  ;;  %s846_s1 = sshll.u32 %s1190_s0, 4  ;;  %s847_s1 = int_to_ptr.vmem [resolvable:$true] %s846_s1 }
  0x33   :  { %436 = vmatprep.subr.bf16.mxu0 %v1042_v12  ;;  %993 = vmatprep.subr.bf16.mxu1 %v1042_v12  ;;  %s1160_s21 = scalar_lea.vmem %s847_s1, 4096  ;;  %p1165_p11 = scmp.lt.s32.totalorder %s847_s1, %s847_s1 }
  0x34   :  { %p1161_p10 = scmp.ne.s32.totalorder %s847_s1, %s1160_s21  ;;  %p1166_p12 = scmp.lt.s32.totalorder %s1160_s21, %s1160_s21 }
  0x36   :  { %437 = vmatpush1.bf16.msra.mxu0 %v1044_v14  ;;  %1009 = vmatpush1.bf16.msra.mxu1 %v1044_v14  ;;  %p1167_p13 = por %p1166_p12, %p1165_p11 }
  0x37   :  { %438 = vmatprep.subr.bf16.mxu0 %v1045_v16  ;;  %994 = vmatprep.subr.bf16.mxu1 %v1045_v16 }
  0x38   :  { %p1168_p0 = pnand %p1167_p13, %p1161_p10 }
  0x3a   :  { %439 = vmatpush1.bf16.msra.mxu0 %v1047_v17  ;;  %1010 = vmatpush1.bf16.msra.mxu1 %v1047_v17 }
  0x3b   :  { %440 = vmatprep.subr.bf16.mxu0 %v1048_v18  ;;  %995 = vmatprep.subr.bf16.mxu1 %v1048_v18 }
  0x3e   :  { %441 = vmatpush2.bf16.msra.mxu0 %v1050_v19  ;;  %1011 = vmatpush2.bf16.msra.mxu1 %v1050_v19 }
  0x3f   :  { %442 = vmatprep.subr.bf16.mxu0 %v1051_v20  ;;  %996 = vmatprep.subr.bf16.mxu1 %v1051_v20 }
  0x42   :  { %443 = vmatpush2.bf16.msra.mxu0 %v1053_v21  ;;  %1012 = vmatpush2.bf16.msra.mxu1 %v1053_v21 }
  0x43   :  { %444 = vmatprep.subr.bf16.mxu0 %v1054_v22  ;;  %997 = vmatprep.subr.bf16.mxu1 %v1054_v22 }
  0x46   :  { %445 = vmatpush2.bf16.msra.mxu0 %v1056_v23  ;;  %1013 = vmatpush2.bf16.msra.mxu1 %v1056_v23 }
  0x47   :  { %446 = vmatprep.subr.bf16.mxu0 %v1057_v24  ;;  %998 = vmatprep.subr.bf16.mxu1 %v1057_v24 }
  0x4a   :  { %447 = vmatpush2.bf16.msra.mxu0 %v1059_v25  ;;  %1014 = vmatpush2.bf16.msra.mxu1 %v1059_v25 }
  0x4b   :  { %448 = vmatprep.subr.bf16.mxu0 %v1060_v26  ;;  %999 = vmatprep.subr.bf16.mxu1 %v1060_v26 }
  0x4e   :  { %449 = vmatpush2.bf16.msra.mxu0 %v1062_v27  ;;  %1015 = vmatpush2.bf16.msra.mxu1 %v1062_v27 }
  0x4f   :  { %450 = vmatprep.subr.bf16.mxu0 %v1063_v28  ;;  %1000 = vmatprep.subr.bf16.mxu1 %v1063_v28 }
  0x52   :  { %451 = vmatpush2.bf16.msra.mxu0 %v1065_v29  ;;  %1016 = vmatpush2.bf16.msra.mxu1 %v1065_v29 }
  0x53   :  { %452 = vmatprep.subr.bf16.mxu0 %v1066_v30  ;;  %1001 = vmatprep.subr.bf16.mxu1 %v1066_v30 }
  0x56   :  { %453 = vmatpush2.bf16.msra.mxu0 %v1068_v31  ;;  %1017 = vmatpush2.bf16.msra.mxu1 %v1068_v31 }
  0x57   :  { %454 = vmatprep.subr.bf16.mxu0 %v1069_v32  ;;  %1002 = vmatprep.subr.bf16.mxu1 %v1069_v32 }
  0x5a   :  { %455 = vmatpush2.bf16.msra.mxu0 %v1071_v33  ;;  %1018 = vmatpush2.bf16.msra.mxu1 %v1071_v33 }
  0x5d   :  { %457 = vmatmul.mubr.bf16.vlgmr.msra.gmra.mxu0 %v1072_v34  ;;  %537 = vmatmul.mubr.bf16.vlgmr.msra.gmra.mxu1 %v1075_v35 }
  0x5e   :  { %466 = vmatprep.mubr.bf16.mxu0 %v1078_v36  ;;  %546 = vmatprep.mubr.bf16.mxu1 %v1080_v37 }
  0x65   :  { %467 = vmatmul.mubr.bf16.gmra.mxu0 %v1082_v38  ;;  %547 = vmatmul.mubr.bf16.gmra.mxu1 %v1083_v39 }
  0x66   :  { %476 = vmatprep.mubr.bf16.mxu0 %v1084_v40  ;;  %556 = vmatprep.mubr.bf16.mxu1 %v1086_v41 }
  0x6d   :  { %477 = vmatmul.mubr.bf16.gmra.mxu0 %v1088_v42  ;;  %557 = vmatmul.mubr.bf16.gmra.mxu1 %v1089_v43 }
  0x6e   :  { %486 = vmatprep.mubr.bf16.mxu0 %v1090_v44  ;;  %566 = vmatprep.mubr.bf16.mxu1 %v1092_v45 }
  0x75   :  { %487 = vmatmul.mubr.bf16.gmra.mxu0 %v1094_v46  ;;  %567 = vmatmul.mubr.bf16.gmra.mxu1 %v1095_v47 }
  0x76   :  { %496 = vmatprep.mubr.bf16.mxu0 %v1096_v48  ;;  %576 = vmatprep.mubr.bf16.mxu1 %v1098_v49 }
  0x7d   :  { %497 = vmatmul.mubr.bf16.gmra.mxu0 %v1100_v50  ;;  %577 = vmatmul.mubr.bf16.gmra.mxu1 %v1101_v51 }
  0x7e   :  { %506 = vmatprep.mubr.bf16.mxu0 %v1102_v52  ;;  %586 = vmatprep.mubr.bf16.mxu1 %v1104_v53 }
  0x85   :  { %507 = vmatmul.mubr.bf16.gmra.mxu0 %v1106_v54  ;;  %587 = vmatmul.mubr.bf16.gmra.mxu1 %v1107_v55 }
  0x86   :  { %516 = vmatprep.mubr.bf16.mxu0 %v1108_v56  ;;  %596 = vmatprep.mubr.bf16.mxu1 %v1110_v57 }
  0x8d   :  { %517 = vmatmul.mubr.bf16.gmra.mxu0 %v1112_v58  ;;  %597 = vmatmul.mubr.bf16.gmra.mxu1 %v1113_v59 }
  0x8e   :  { %526 = vmatprep.mubr.bf16.mxu0 %v1114_v60  ;;  %606 = vmatprep.mubr.bf16.mxu1 %v1116_v61 }
  0x95   :  { %527 = vmatmul.mubr.bf16.gmra.mxu0 %v1118_v62  ;;  %607 = vmatmul.mubr.bf16.gmra.mxu1 %v1119_v63 }
 0x11d   :  { %v458_v0 = vpop.f32.mrf.mxu0  ;;  %v538_v1 = vpop.f32.mrf.mxu1 }
 0x11f   :  { %v460_v2 = vpop.f32.mrf.mxu0  ;;  %v540_v3 = vpop.f32.mrf.mxu1 }
 0x120   :  { %v955_v4 = vpack.c.bf16 %v460_v2, %v458_v0  ;;  %v971_v5 = vpack.c.bf16 %v540_v3, %v538_v1 }
 0x121   :  { %v462_v6 = vpop.f32.mrf.mxu0  ;;  %v542_v7 = vpop.f32.mrf.mxu1 }
 0x122   :  { %809 = vst [vmem:[#allocation7] sm:$0xff] %v955_v4  ;;  %825 = vst [vmem:[#allocation7 + $0x80] sm:$0xff] %v971_v5 }
 0x123   :  { %v464_v8 = vpop.f32.mrf.mxu0  ;;  %v544_v9 = vpop.f32.mrf.mxu1 }
 0x124   :  { %v956_v10 = vpack.c.bf16 %v464_v8, %v462_v6  ;;  %v972_v11 = vpack.c.bf16 %v544_v9, %v542_v7 }
 0x125   :  { %v468_v12 = vpop.f32.mrf.mxu0  ;;  %v548_v13 = vpop.f32.mrf.mxu1 }
 0x126   :  { %810 = vst [vmem:[#allocation7 + $0x8] sm:$0xff] %v956_v10  ;;  %826 = vst [vmem:[#allocation7 + $0x88] sm:$0xff] %v972_v11 }
 0x127   :  { %v470_v14 = vpop.f32.mrf.mxu0  ;;  %v550_v15 = vpop.f32.mrf.mxu1 }
 0x128   :  { %v957_v16 = vpack.c.bf16 %v470_v14, %v468_v12  ;;  %v973_v17 = vpack.c.bf16 %v550_v15, %v548_v13 }
 0x129   :  { %v472_v18 = vpop.f32.mrf.mxu0  ;;  %v552_v19 = vpop.f32.mrf.mxu1 }
 0x12a   :  { %811 = vst [vmem:[#allocation7 + $0x10] sm:$0xff] %v957_v16  ;;  %827 = vst [vmem:[#allocation7 + $0x90] sm:$0xff] %v973_v17 }
 0x12b   :  { %v474_v20 = vpop.f32.mrf.mxu0  ;;  %v554_v21 = vpop.f32.mrf.mxu1 }
 0x12c   :  { %v958_v22 = vpack.c.bf16 %v474_v20, %v472_v18  ;;  %v974_v23 = vpack.c.bf16 %v554_v21, %v552_v19 }
 0x12d   :  { %v478_v24 = vpop.f32.mrf.mxu0  ;;  %v558_v25 = vpop.f32.mrf.mxu1 }
 0x12e   :  { %812 = vst [vmem:[#allocation7 + $0x18] sm:$0xff] %v958_v22  ;;  %828 = vst [vmem:[#allocation7 + $0x98] sm:$0xff] %v974_v23 }
 0x12f   :  { %v480_v26 = vpop.f32.mrf.mxu0  ;;  %v560_v27 = vpop.f32.mrf.mxu1 }
 0x130   :  { %v959_v28 = vpack.c.bf16 %v480_v26, %v478_v24  ;;  %v975_v29 = vpack.c.bf16 %v560_v27, %v558_v25 }
 0x131   :  { %v482_v30 = vpop.f32.mrf.mxu0  ;;  %v562_v31 = vpop.f32.mrf.mxu1 }
 0x132   :  { %813 = vst [vmem:[#allocation7 + $0x20] sm:$0xff] %v959_v28  ;;  %829 = vst [vmem:[#allocation7 + $0xa0] sm:$0xff] %v975_v29 }
 0x133   :  { %v484_v32 = vpop.f32.mrf.mxu0  ;;  %v564_v33 = vpop.f32.mrf.mxu1 }
 0x134   :  { %v960_v34 = vpack.c.bf16 %v484_v32, %v482_v30  ;;  %v976_v35 = vpack.c.bf16 %v564_v33, %v562_v31 }
 0x135   :  { %v488_v36 = vpop.f32.mrf.mxu0  ;;  %v568_v37 = vpop.f32.mrf.mxu1 }
 0x136   :  { %814 = vst [vmem:[#allocation7 + $0x28] sm:$0xff] %v960_v34  ;;  %830 = vst [vmem:[#allocation7 + $0xa8] sm:$0xff] %v976_v35 }
 0x137   :  { %v490_v38 = vpop.f32.mrf.mxu0  ;;  %v570_v39 = vpop.f32.mrf.mxu1 }
 0x138   :  { %v961_v40 = vpack.c.bf16 %v490_v38, %v488_v36  ;;  %v977_v41 = vpack.c.bf16 %v570_v39, %v568_v37 }
 0x139   :  { %v492_v42 = vpop.f32.mrf.mxu0  ;;  %v572_v43 = vpop.f32.mrf.mxu1 }
 0x13a   :  { %815 = vst [vmem:[#allocation7 + $0x30] sm:$0xff] %v961_v40  ;;  %831 = vst [vmem:[#allocation7 + $0xb0] sm:$0xff] %v977_v41 }
 0x13b   :  { %v494_v44 = vpop.f32.mrf.mxu0  ;;  %v574_v45 = vpop.f32.mrf.mxu1 }
 0x13c   :  { %v962_v46 = vpack.c.bf16 %v494_v44, %v492_v42  ;;  %v978_v47 = vpack.c.bf16 %v574_v45, %v572_v43 }
 0x13d   :  { %v498_v48 = vpop.f32.mrf.mxu0  ;;  %v578_v49 = vpop.f32.mrf.mxu1 }
 0x13e   :  { %816 = vst [vmem:[#allocation7 + $0x38] sm:$0xff] %v962_v46  ;;  %832 = vst [vmem:[#allocation7 + $0xb8] sm:$0xff] %v978_v47 }
 0x13f   :  { %v500_v50 = vpop.f32.mrf.mxu0  ;;  %v580_v51 = vpop.f32.mrf.mxu1 }
 0x140   :  { %v963_v52 = vpack.c.bf16 %v500_v50, %v498_v48  ;;  %v979_v53 = vpack.c.bf16 %v580_v51, %v578_v49 }
 0x141   :  { %v502_v54 = vpop.f32.mrf.mxu0  ;;  %v582_v55 = vpop.f32.mrf.mxu1 }
 0x142   :  { %817 = vst [vmem:[#allocation7 + $0x40] sm:$0xff] %v963_v52  ;;  %833 = vst [vmem:[#allocation7 + $0xc0] sm:$0xff] %v979_v53 }
 0x143   :  { %v504_v56 = vpop.f32.mrf.mxu0  ;;  %v584_v57 = vpop.f32.mrf.mxu1 }
 0x144   :  { %v964_v58 = vpack.c.bf16 %v504_v56, %v502_v54  ;;  %v980_v59 = vpack.c.bf16 %v584_v57, %v582_v55 }
 0x145   :  { %v508_v60 = vpop.f32.mrf.mxu0  ;;  %v588_v61 = vpop.f32.mrf.mxu1 }
 0x146   :  { %818 = vst [vmem:[#allocation7 + $0x48] sm:$0xff] %v964_v58  ;;  %834 = vst [vmem:[#allocation7 + $0xc8] sm:$0xff] %v980_v59 }
 0x147   :  { %v510_v62 = vpop.f32.mrf.mxu0  ;;  %v590_v63 = vpop.f32.mrf.mxu1 }
 0x148   :  { %v965_v0 = vpack.c.bf16 %v510_v62, %v508_v60  ;;  %v981_v1 = vpack.c.bf16 %v590_v63, %v588_v61 }
 0x149   :  { %v512_v2 = vpop.f32.mrf.mxu0  ;;  %v592_v3 = vpop.f32.mrf.mxu1 }
 0x14a   :  { %819 = vst [vmem:[#allocation7 + $0x50] sm:$0xff] %v965_v0  ;;  %835 = vst [vmem:[#allocation7 + $0xd0] sm:$0xff] %v981_v1 }
 0x14b   :  { %v514_v4 = vpop.f32.mrf.mxu0  ;;  %v594_v5 = vpop.f32.mrf.mxu1 }
 0x14c   :  { %v966_v6 = vpack.c.bf16 %v514_v4, %v512_v2  ;;  %v982_v7 = vpack.c.bf16 %v594_v5, %v592_v3 }
 0x14d   :  { %v518_v8 = vpop.f32.mrf.mxu0  ;;  %v598_v9 = vpop.f32.mrf.mxu1 }
 0x14e   :  { %820 = vst [vmem:[#allocation7 + $0x58] sm:$0xff] %v966_v6  ;;  %836 = vst [vmem:[#allocation7 + $0xd8] sm:$0xff] %v982_v7 }
 0x14f   :  { %v520_v10 = vpop.f32.mrf.mxu0  ;;  %v600_v11 = vpop.f32.mrf.mxu1 }
 0x150   :  { %v967_v12 = vpack.c.bf16 %v520_v10, %v518_v8  ;;  %v983_v13 = vpack.c.bf16 %v600_v11, %v598_v9 }
 0x151   :  { %v522_v14 = vpop.f32.mrf.mxu0  ;;  %v602_v15 = vpop.f32.mrf.mxu1 }
 0x152   :  { %821 = vst [vmem:[#allocation7 + $0x60] sm:$0xff] %v967_v12  ;;  %837 = vst [vmem:[#allocation7 + $0xe0] sm:$0xff] %v983_v13 }
 0x153   :  { %v524_v16 = vpop.f32.mrf.mxu0  ;;  %v604_v17 = vpop.f32.mrf.mxu1 }
 0x154   :  { %v968_v18 = vpack.c.bf16 %v524_v16, %v522_v14  ;;  %v984_v19 = vpack.c.bf16 %v604_v17, %v602_v15 }
 0x155   :  { %v528_v20 = vpop.f32.mrf.mxu0  ;;  %v608_v21 = vpop.f32.mrf.mxu1 }
 0x156   :  { %822 = vst [vmem:[#allocation7 + $0x68] sm:$0xff] %v968_v18  ;;  %838 = vst [vmem:[#allocation7 + $0xe8] sm:$0xff] %v984_v19 }
 0x157   :  { %v530_v22 = vpop.f32.mrf.mxu0  ;;  %v610_v23 = vpop.f32.mrf.mxu1 }
 0x158   :  { %v969_v24 = vpack.c.bf16 %v530_v22, %v528_v20  ;;  %v985_v25 = vpack.c.bf16 %v610_v23, %v608_v21 }
 0x159   :  { %v532_v26 = vpop.f32.mrf.mxu0  ;;  %v612_v27 = vpop.f32.mrf.mxu1 }
 0x15a   :  { %823 = vst [vmem:[#allocation7 + $0x70] sm:$0xff] %v969_v24  ;;  %839 = vst [vmem:[#allocation7 + $0xf0] sm:$0xff] %v985_v25 }
 0x15b   :  { %v534_v28 = vpop.f32.mrf.mxu0  ;;  %v614_v29 = vpop.f32.mrf.mxu1 }
 0x15c   :  { %v970_v30 = vpack.c.bf16 %v534_v28, %v532_v26  ;;  %v986_v31 = vpack.c.bf16 %v614_v29, %v612_v27 }
 0x15e   :  { %824 = vst [vmem:[#allocation7 + $0x78] sm:$0xff] %v970_v30  ;;  %840 = vst [vmem:[#allocation7 + $0xf8] sm:$0xff] %v986_v31 }
 0x15f   :  { %1171 = shalt.err (!%p1168_p0)
}
 0x160   :  { %852 = dma.vmem_to_hbm [thread:$0]  %s847_s1, 4096, %s1226_s2, [#allocation4], %s1187_s12, %s1187_s12, %s1188_s13  }
 0x161   :  { %1184 = dma.done.wait [#allocation4], 4096  }
 0x162   :  { %1185 = vsyncadd [#allocation4], 4294963200 }
 0x163   :  { %856 = vsyncpa [#allocation3], 1 }
 0x164   :  { %857 = vsyncpa [#allocation6], 1 }
 0x165   :  { %858 = vsyncpa [#allocation4], 1 }

</bundles_post_ra>
